<compile_context>
chip_gen: v5e
topology: v5e:2x2
jax: 0.10.0
libtpu: 0.0.40
codegen_flags: <defaults>
</compile_context>

<pallas_src>
import math
import functools

import jax
import jax.numpy as jnp
from jax import lax
from jax.experimental import pallas as pl
from jax.experimental.pallas import tpu as pltpu


def _round_up(a, b):
    return (a + b - 1) // b * b


# ----------------------------- Pallas kernel --------------------------------


def _equal_conv_transpose_kernel(xp_ref, w_ref, b_ref, o_ref, *,
                                 tap_shifts, tp, win):
    """One output tile: out(Cout,TP) = sum_t W_t(Cout,Cin) @ x[base+s_t:+TP] + b.

    xp_ref : (Cin, L_in)       bf16, flattened dilated/padded canvas (resident)
    w_ref  : (K*K, Cout, Cin)  bf16, flipped + equal-lr-scaled kernel taps
    b_ref  : (Cout, 1)         f32
    o_ref  : (Cout, TP)        output tile (lane-dense, TP % 128 == 0)
    """
    base = pl.multiple_of(pl.program_id(0) * tp, 128)
    # One aligned, lane-dense window load covering the tile plus the tap halo.
    xwin = xp_ref[:, pl.ds(base, win)]                       # (Cin, WIN) bf16
    acc = jnp.zeros(o_ref.shape, jnp.float32)
    for t, s in enumerate(tap_shifts):                       # K*K static taps
        xs = xwin[:, s:s + tp]                               # (Cin, TP) lane shift
        acc += lax.dot_general(
            w_ref[t], xs,
            dimension_numbers=(((1,), (0,)), ((), ())),
            preferred_element_type=jnp.float32)              # f32 accumulation
    o_ref[...] = (acc + b_ref[...]).astype(o_ref.dtype)


# ----------------------------- wrapper ---------------------------------------


def equal_conv_transpose2d(x, weight, bias=None, stride=1, padding=0,
                           lane_tile=None):
    """EqualConvTranspose2d forward.

    x:      (N, Cin, H, W)        NCHW, matching the PyTorch module
    weight: (Cin, Cout, K, K)     PyTorch conv_transpose2d weight layout
    bias:   (Cout,) or None
    Returns (N, Cout, Hout, Wout) with Hout = (H-1)*stride + K - 2*padding.
    """
    N, Cin, H, W = x.shape
    Cin_w, Cout, K, K2 = weight.shape
    assert Cin == Cin_w and K == K2
    assert stride >= 1
    if not (0 <= padding <= K - 1):
        raise NotImplementedError("padding > kernel_size - 1 not supported")

    scale = 1.0 / math.sqrt(Cin * K * K)
    q = K - 1 - padding                                     # halo of equivalent correlation
    Hd, Wd = (H - 1) * stride + 1, (W - 1) * stride + 1     # stride-dilated extent
    Hp, Wp = Hd + 2 * q, Wd + 2 * q                         # padded canvas
    Hout, Wout = Hp - (K - 1), Wp - (K - 1)

    # ---- flat-canvas geometry (batch folded into the lane axis) ----
    L_canvas = N * Hp * Wp            # output computed on the full canvas, cropped later
    if lane_tile is None:
        # >=2 grid cells when possible (v7x: 2 TCs); 1024 bf16 lanes per tile keeps
        # the double-buffered working set tiny even on v7x's 64 MiB VMEM.
        lane_tile = min(1024, _round_up((L_canvas + 1) // 2, 128))
    TP = max(128, _round_up(lane_tile, 128))
    L_pad = _round_up(L_canvas, TP)
    S_max = (K - 1) * (Wp + 1)        # largest tap shift on the flat canvas
    HALO = _round_up(S_max, 128)
    WIN = TP + HALO
    L_in = L_pad + HALO
    grid = (L_pad // TP,)

    # ---- weight prep (tiny, weight-only): correlation form of conv_transpose ----
    #   wtaps[dh*K+dw, co, ci] = scale * weight[ci, co, K-1-dh, K-1-dw]
    wflip = jnp.flip(weight, axis=(2, 3))                    # (Cin, Cout, K, K)
    wtaps = (jnp.transpose(wflip, (2, 3, 1, 0))              # (K, K, Cout, Cin)
             .reshape(K * K, Cout, Cin) * scale).astype(jnp.bfloat16)
    bias2d = (jnp.zeros((Cout, 1), jnp.float32) if bias is None
              else bias.reshape(Cout, 1).astype(jnp.float32))

    # ---- activation prep: stride-dilation + halo, flattened channel-major ----
    xp = jnp.zeros((N, Cin, Hp, Wp), x.dtype)
    xp = xp.at[:, :, q:q + Hd:stride, q:q + Wd:stride].set(x)
    xp_flat = jnp.transpose(xp, (1, 0, 2, 3)).reshape(Cin, L_canvas)
    xp_flat = jnp.pad(xp_flat, ((0, 0), (0, L_in - L_canvas))).astype(jnp.bfloat16)

    tap_shifts = tuple(dh * Wp + dw for dh in range(K) for dw in range(K))

    kernel = functools.partial(_equal_conv_transpose_kernel,
                               tap_shifts=tap_shifts, tp=TP, win=WIN)

    out_canvas = pl.pallas_call(
        kernel,
        out_shape=jax.ShapeDtypeStruct((Cout, L_pad), x.dtype),
        grid=grid,
        in_specs=[
            pl.BlockSpec((Cin, L_in), lambda i: (0, 0)),          # canvas: VMEM-resident
            pl.BlockSpec((K * K, Cout, Cin), lambda i: (0, 0, 0)),  # weights: resident
            pl.BlockSpec((Cout, 1), lambda i: (0, 0)),            # bias: resident
        ],
        out_specs=pl.BlockSpec((Cout, TP), lambda i: (0, i)),     # lane-dense store
        compiler_params=pltpu.CompilerParams(
            dimension_semantics=("parallel",),
            vmem_limit_bytes=32 * 1024 * 1024),
    )(xp_flat, wtaps, bias2d)

    # Crop the canvas: drop lane padding, garbage columns/rows, un-fold batch.
    out = out_canvas[:, :L_canvas].reshape(Cout, N, Hp, Wp)[:, :, :Hout, :Wout]
    return jnp.transpose(out, (1, 0, 2, 3))


# ----------------------------- pure-JAX reference ---------------------------


def ref_conv_transpose2d(x, weight, bias=None, stride=1, padding=0):
    """Reference via lax.conv_general_dilated (fractionally-strided conv)."""
    Cin, Cout, K, _ = weight.shape
    scale = 1.0 / math.sqrt(Cin * K * K)
    # wt[o, i, dh, dw] = weight[i, o, K-1-dh, K-1-dw]
    wt = jnp.transpose(jnp.flip(weight, axis=(2, 3)), (1, 0, 2, 3)) * scale
    out = lax.conv_general_dilated(
        x, wt, window_strides=(1, 1),
        padding=[(K - 1 - padding, K - 1 - padding)] * 2,
        lhs_dilation=(stride, stride),
        dimension_numbers=("NCHW", "OIHW", "NCHW"),
        precision=lax.Precision.HIGHEST)
    if bias is not None:
        out = out + bias.reshape(1, -1, 1, 1)
    return out


# ----------------------------- main ------------------------------------------

if __name__ == "__main__":
    N, CIN, COUT, K, H, W = 2, 4, 8, 3, 16, 16

    key = jax.random.PRNGKey(0)
    k0, k1, k2 = jax.random.split(key, 3)
    x = jax.random.normal(k0, (N, CIN, H, W), jnp.float32)
    weight = jax.random.normal(k1, (CIN, COUT, K, K), jnp.float32)   # PyTorch layout
    bias = 0.1 * jax.random.normal(k2, (COUT,), jnp.float32)

    # bf16-operand / f32-accumulate kernel vs f32 HIGHEST reference -> loose tol.
    RTOL = ATOL = 5e-2

    # Config 1: module defaults (stride=1, padding=0, bias=True).
    out1 = jax.block_until_ready(
        equal_conv_transpose2d(x, weight, bias, stride=1, padding=0))
    ref1 = ref_conv_transpose2d(x, weight, bias, stride=1, padding=0)
    assert out1.shape == (N, COUT, H + K - 1, W + K - 1), out1.shape
    assert jnp.allclose(out1, ref1, rtol=RTOL, atol=ATOL), (
        float(jnp.max(jnp.abs(out1 - ref1))))

    # Config 2: typical upsampling use (stride=2, padding=1, bias=None).
    out2 = jax.block_until_ready(
        equal_conv_transpose2d(x, weight, None, stride=2, padding=1))
    ref2 = ref_conv_transpose2d(x, weight, None, stride=2, padding=1)
    assert out2.shape == (N, COUT, (H - 1) * 2 + K - 2, (W - 1) * 2 + K - 2), out2.shape
    assert jnp.allclose(out2, ref2, rtol=RTOL, atol=ATOL), (
        float(jnp.max(jnp.abs(out2 - ref2))))

    print("KERNEL_OK")
</pallas_src>

<mosaic_0001>
module attributes {stable_mosaic.version = 11 : i64} {
  func.func @_equal_conv_transpose_kernel(%arg0: i32, %arg1: memref<4x1152xbf16, #tpu.memory_space<vmem>>, %arg2: memref<9x8x4xbf16, #tpu.memory_space<vmem>>, %arg3: memref<8x1xf32, #tpu.memory_space<vmem>>, %arg4: memref<8x512xf32, #tpu.memory_space<vmem>>) attributes {dimension_semantics = [#tpu.dimension_semantics<parallel>], iteration_bounds = array<i64: 2>, scalar_prefetch = 0 : i64, scratch_operands = 0 : i64, tpu.core_type = #tpu.core_type<tc>, window_params = [{pipeline_mode = #tpu.pipeline_mode<synchronous>, transform_indices = @transform_0, window_bounds = array<i64: 4, 1152>}, {pipeline_mode = #tpu.pipeline_mode<synchronous>, transform_indices = @transform_1, window_bounds = array<i64: 9, 8, 4>}, {pipeline_mode = #tpu.pipeline_mode<synchronous>, transform_indices = @transform_2, window_bounds = array<i64: 8, 1>}, {transform_indices = @transform_3, window_bounds = array<i64: 8, 512>}]} {
    %c512_i32 = arith.constant 512 : i32
    %0 = arith.muli %arg0, %c512_i32 : i32
    %1 = tpu.assume_multiple %0, 128 : i32
    %c0 = arith.constant 0 : index
    %2 = arith.index_cast %1 : i32 to index
    %3 = vector.load %arg1[%c0, %2] : memref<4x1152xbf16, #tpu.memory_space<vmem>>, vector<4x640xbf16>
    %cst = arith.constant 0.000000e+00 : f32
    %4 = vector.broadcast %cst : f32 to vector<8x512xf32>
    %5 = vector.extract_strided_slice %3 {offsets = [0, 0], sizes = [4, 512], strides = [1, 1]} : vector<4x640xbf16> to vector<4x512xbf16>
    %c0_0 = arith.constant 0 : index
    %c0_1 = arith.constant 0 : index
    %c0_2 = arith.constant 0 : index
    %6 = vector.load %arg2[%c0_0, %c0_1, %c0_2] : memref<9x8x4xbf16, #tpu.memory_space<vmem>>, vector<1x8x4xbf16>
    %7 = vector.shape_cast %6 : vector<1x8x4xbf16> to vector<8x4xbf16>
    %cst_3 = arith.constant dense<0.000000e+00> : vector<8x512xf32>
    %8 = tpu.matmul %7, %5, %cst_3 {dimension_numbers = #tpu.dot_dimension_numbers<[1], [0], [0], [1], [0, 0, 1, 1], [], []>} : vector<8x4xbf16>, vector<4x512xbf16>, vector<8x512xf32> -> vector<8x512xf32>
    %9 = arith.addf %4, %8 : vector<8x512xf32>
    %10 = vector.extract_strided_slice %3 {offsets = [0, 1], sizes = [4, 512], strides = [1, 1]} : vector<4x640xbf16> to vector<4x512xbf16>
    %c1 = arith.constant 1 : index
    %c0_4 = arith.constant 0 : index
    %c0_5 = arith.constant 0 : index
    %11 = vector.load %arg2[%c1, %c0_4, %c0_5] : memref<9x8x4xbf16, #tpu.memory_space<vmem>>, vector<1x8x4xbf16>
    %12 = vector.shape_cast %11 : vector<1x8x4xbf16> to vector<8x4xbf16>
    %cst_6 = arith.constant dense<0.000000e+00> : vector<8x512xf32>
    %13 = tpu.matmul %12, %10, %cst_6 {dimension_numbers = #tpu.dot_dimension_numbers<[1], [0], [0], [1], [0, 0, 1, 1], [], []>} : vector<8x4xbf16>, vector<4x512xbf16>, vector<8x512xf32> -> vector<8x512xf32>
    %14 = arith.addf %9, %13 : vector<8x512xf32>
    %15 = vector.extract_strided_slice %3 {offsets = [0, 2], sizes = [4, 512], strides = [1, 1]} : vector<4x640xbf16> to vector<4x512xbf16>
    %c2 = arith.constant 2 : index
    %c0_7 = arith.constant 0 : index
    %c0_8 = arith.constant 0 : index
    %16 = vector.load %arg2[%c2, %c0_7, %c0_8] : memref<9x8x4xbf16, #tpu.memory_space<vmem>>, vector<1x8x4xbf16>
    %17 = vector.shape_cast %16 : vector<1x8x4xbf16> to vector<8x4xbf16>
    %cst_9 = arith.constant dense<0.000000e+00> : vector<8x512xf32>
    %18 = tpu.matmul %17, %15, %cst_9 {dimension_numbers = #tpu.dot_dimension_numbers<[1], [0], [0], [1], [0, 0, 1, 1], [], []>} : vector<8x4xbf16>, vector<4x512xbf16>, vector<8x512xf32> -> vector<8x512xf32>
    %19 = arith.addf %14, %18 : vector<8x512xf32>
    %20 = vector.extract_strided_slice %3 {offsets = [0, 20], sizes = [4, 512], strides = [1, 1]} : vector<4x640xbf16> to vector<4x512xbf16>
    %c3 = arith.constant 3 : index
    %c0_10 = arith.constant 0 : index
    %c0_11 = arith.constant 0 : index
    %21 = vector.load %arg2[%c3, %c0_10, %c0_11] : memref<9x8x4xbf16, #tpu.memory_space<vmem>>, vector<1x8x4xbf16>
    %22 = vector.shape_cast %21 : vector<1x8x4xbf16> to vector<8x4xbf16>
    %cst_12 = arith.constant dense<0.000000e+00> : vector<8x512xf32>
    %23 = tpu.matmul %22, %20, %cst_12 {dimension_numbers = #tpu.dot_dimension_numbers<[1], [0], [0], [1], [0, 0, 1, 1], [], []>} : vector<8x4xbf16>, vector<4x512xbf16>, vector<8x512xf32> -> vector<8x512xf32>
    %24 = arith.addf %19, %23 : vector<8x512xf32>
    %25 = vector.extract_strided_slice %3 {offsets = [0, 21], sizes = [4, 512], strides = [1, 1]} : vector<4x640xbf16> to vector<4x512xbf16>
    %c4 = arith.constant 4 : index
    %c0_13 = arith.constant 0 : index
    %c0_14 = arith.constant 0 : index
    %26 = vector.load %arg2[%c4, %c0_13, %c0_14] : memref<9x8x4xbf16, #tpu.memory_space<vmem>>, vector<1x8x4xbf16>
    %27 = vector.shape_cast %26 : vector<1x8x4xbf16> to vector<8x4xbf16>
    %cst_15 = arith.constant dense<0.000000e+00> : vector<8x512xf32>
    %28 = tpu.matmul %27, %25, %cst_15 {dimension_numbers = #tpu.dot_dimension_numbers<[1], [0], [0], [1], [0, 0, 1, 1], [], []>} : vector<8x4xbf16>, vector<4x512xbf16>, vector<8x512xf32> -> vector<8x512xf32>
    %29 = arith.addf %24, %28 : vector<8x512xf32>
    %30 = vector.extract_strided_slice %3 {offsets = [0, 22], sizes = [4, 512], strides = [1, 1]} : vector<4x640xbf16> to vector<4x512xbf16>
    %c5 = arith.constant 5 : index
    %c0_16 = arith.constant 0 : index
    %c0_17 = arith.constant 0 : index
    %31 = vector.load %arg2[%c5, %c0_16, %c0_17] : memref<9x8x4xbf16, #tpu.memory_space<vmem>>, vector<1x8x4xbf16>
    %32 = vector.shape_cast %31 : vector<1x8x4xbf16> to vector<8x4xbf16>
    %cst_18 = arith.constant dense<0.000000e+00> : vector<8x512xf32>
    %33 = tpu.matmul %32, %30, %cst_18 {dimension_numbers = #tpu.dot_dimension_numbers<[1], [0], [0], [1], [0, 0, 1, 1], [], []>} : vector<8x4xbf16>, vector<4x512xbf16>, vector<8x512xf32> -> vector<8x512xf32>
    %34 = arith.addf %29, %33 : vector<8x512xf32>
    %35 = vector.extract_strided_slice %3 {offsets = [0, 40], sizes = [4, 512], strides = [1, 1]} : vector<4x640xbf16> to vector<4x512xbf16>
    %c6 = arith.constant 6 : index
    %c0_19 = arith.constant 0 : index
    %c0_20 = arith.constant 0 : index
    %36 = vector.load %arg2[%c6, %c0_19, %c0_20] : memref<9x8x4xbf16, #tpu.memory_space<vmem>>, vector<1x8x4xbf16>
    %37 = vector.shape_cast %36 : vector<1x8x4xbf16> to vector<8x4xbf16>
    %cst_21 = arith.constant dense<0.000000e+00> : vector<8x512xf32>
    %38 = tpu.matmul %37, %35, %cst_21 {dimension_numbers = #tpu.dot_dimension_numbers<[1], [0], [0], [1], [0, 0, 1, 1], [], []>} : vector<8x4xbf16>, vector<4x512xbf16>, vector<8x512xf32> -> vector<8x512xf32>
    %39 = arith.addf %34, %38 : vector<8x512xf32>
    %40 = vector.extract_strided_slice %3 {offsets = [0, 41], sizes = [4, 512], strides = [1, 1]} : vector<4x640xbf16> to vector<4x512xbf16>
    %c7 = arith.constant 7 : index
    %c0_22 = arith.constant 0 : index
    %c0_23 = arith.constant 0 : index
    %41 = vector.load %arg2[%c7, %c0_22, %c0_23] : memref<9x8x4xbf16, #tpu.memory_space<vmem>>, vector<1x8x4xbf16>
    %42 = vector.shape_cast %41 : vector<1x8x4xbf16> to vector<8x4xbf16>
    %cst_24 = arith.constant dense<0.000000e+00> : vector<8x512xf32>
    %43 = tpu.matmul %42, %40, %cst_24 {dimension_numbers = #tpu.dot_dimension_numbers<[1], [0], [0], [1], [0, 0, 1, 1], [], []>} : vector<8x4xbf16>, vector<4x512xbf16>, vector<8x512xf32> -> vector<8x512xf32>
    %44 = arith.addf %39, %43 : vector<8x512xf32>
    %45 = vector.extract_strided_slice %3 {offsets = [0, 42], sizes = [4, 512], strides = [1, 1]} : vector<4x640xbf16> to vector<4x512xbf16>
    %c8 = arith.constant 8 : index
    %c0_25 = arith.constant 0 : index
    %c0_26 = arith.constant 0 : index
    %46 = vector.load %arg2[%c8, %c0_25, %c0_26] : memref<9x8x4xbf16, #tpu.memory_space<vmem>>, vector<1x8x4xbf16>
    %47 = vector.shape_cast %46 : vector<1x8x4xbf16> to vector<8x4xbf16>
    %cst_27 = arith.constant dense<0.000000e+00> : vector<8x512xf32>
    %48 = tpu.matmul %47, %45, %cst_27 {dimension_numbers = #tpu.dot_dimension_numbers<[1], [0], [0], [1], [0, 0, 1, 1], [], []>} : vector<8x4xbf16>, vector<4x512xbf16>, vector<8x512xf32> -> vector<8x512xf32>
    %49 = arith.addf %44, %48 : vector<8x512xf32>
    %c0_28 = arith.constant 0 : index
    %c0_29 = arith.constant 0 : index
    %50 = vector.load %arg3[%c0_28, %c0_29] : memref<8x1xf32, #tpu.memory_space<vmem>>, vector<8x1xf32>
    %51 = vector.broadcast %50 : vector<8x1xf32> to vector<8x512xf32>
    %52 = arith.addf %49, %51 : vector<8x512xf32>
    %c0_30 = arith.constant 0 : index
    %c0_31 = arith.constant 0 : index
    %53 = vector.load %arg4[%c0_30, %c0_31] : memref<8x512xf32, #tpu.memory_space<vmem>>, vector<8x512xf32>
    tpu.vector_store %arg4[%c0_30, %c0_31], %52 {strides = array<i32>} : memref<8x512xf32, #tpu.memory_space<vmem>>, vector<8x512xf32>,
    return
  }
  func.func @transform_0(%arg0: i32) -> (i32, i32) {
    %c0_i32 = arith.constant 0 : i32
    %c0_i32_0 = arith.constant 0 : i32
    %c0_i32_1 = arith.constant 0 : i32
    return %c0_i32, %c0_i32_0 : i32, i32
  }
  func.func @transform_1(%arg0: i32) -> (i32, i32, i32) {
    %c0_i32 = arith.constant 0 : i32
    %c0_i32_0 = arith.constant 0 : i32
    %c0_i32_1 = arith.constant 0 : i32
    %c0_i32_2 = arith.constant 0 : i32
    return %c0_i32, %c0_i32_0, %c0_i32_1 : i32, i32, i32
  }
  func.func @transform_2(%arg0: i32) -> (i32, i32) {
    %c0_i32 = arith.constant 0 : i32
    %c0_i32_0 = arith.constant 0 : i32
    %c0_i32_1 = arith.constant 0 : i32
    return %c0_i32, %c0_i32_0 : i32, i32
  }
  func.func @transform_3(%arg0: i32) -> (i32, i32) {
    %c0_i32 = arith.constant 0 : i32
    %c0_i32_0 = arith.constant 0 : i32
    return %c0_i32, %arg0 : i32, i32
  }
}

</mosaic_0001>

<bundles_post_ra>
// kernel: tpu_custom_call.1
= control target key start
LH: loop header
LB: loop body
LE: loop exit
PB: predicated region body
PF: predicated region fallthrough
CT: control target
= control target key end

     0   :  { %8 = vsyncpa [#allocation3], 0  ;;  %s1560_s0 = inlined_call_operand.vmem [shape: bf16[4,1152], index: 0, kind: input, shape index: {}]   ;;  %s1561_s1 = inlined_call_operand.vmem [shape: bf16[9,8,4], index: 1, kind: input, shape index: {}]   ;;  %s1562_s2 = inlined_call_operand.vmem [shape: f32[8,1], index: 2, kind: input, shape index: {}]   ;;  %s1563_s3 = inlined_call_operand.hbm [shape: f32[8,1024], index: 3, kind: output, shape index: {}]  }
   0x1   :  { %10 = vsyncpa [#allocation3 + $0x1], 0  ;;  %s1314_s12 = smov 0   ;;  %s1316_s13 = smov 0  }
   0x2   :  { %s1318_s14 = smov 0   ;;  %s1320_s15 = smov 0  }
   0x3 LB: > { %s1335_s16 = sadd.s32 4294967295, %s1283_s15   ;;  %s1115_s17 = sadd.s32 4294967294, %s1283_s15   ;;  %s1283_s15 = sphi %s1320_s15, %s1569_s15   ;;  %s1279_s14 = sphi %s1318_s14, %s1568_s14   ;;  %s1275_s13 = sphi %s1316_s13, %s1567_s13   ;;  %s1271_s12 = sphi %s1314_s12, %s1566_s12  }
   0x4   : > { %s1339_s18 = sadd.s32 1, %s1283_s15   ;;  %s86_s19 = sadd.s32 1, %s1279_s14 }
   0x5   : > { %s83_s20 = ssub.s32 %s1283_s15, %s1339_s18  ;;  %p96_p0 = scmp.ne.s32.totalorder %s1279_s14, %s1275_s13 }
   0x6   : > { %p84_p1 = scmp.eq.s32.totalorder %s83_s20, 0  ;;  %p97_p2 = scmp.eq.s32.totalorder %s1335_s16, 1 }
   0x7   : > { %p102_p3 = scmp.ne.s32.totalorder %s1275_s13, %s1271_s12  ;;  %p103_p4 = scmp.eq.s32.totalorder %s1115_s17, 1 }
   0x8   : > { %s1350_s21 = scalar_select %p84_p1, %s1279_s14, %s86_s19  }
   0x9   : > { %p1352_p5 = por %p97_p2, %p96_p0  ;;  %p1356_p6 = por %p103_p4, %p102_p3 }
   0xa   : > { %p1117_p7 = scmp.ge.s32.totalorder %s1283_s15, 1  ;;  %p130_p8 = scmp.lt.s32.totalorder %s1283_s15, 3 }
   0xc   : > { %p131_p9 = pnand %p1117_p7, %p130_p8 }
   0xd   : > { %s1119_s24 = sshll.u32 (!%p131_p9), %s1335_s16, 9  ;;  %s1285_s30 = smov (!%p131_p9), 127  }
   0xe   : > { %134 = sbr.rel (%p131_p9) target bundleno = 426 (0x1aa), region = 32  ;;  %s152_s25 = sshra.s32 (!%p131_p9), %s1119_s24, 7 }
   0xf   : > { %s1120_s26 = sshll.u32 (!%p131_p9), %s152_s25, 1  ;;  %s1286_s4 = smov (!%p131_p9), 126  }
  0x10   : > { %s155_s29 = scalar_lea.vmem (!%p131_p9), %s1560_s0, %s1120_s26  ;;  %s1287_s5 = smov (!%p131_p9), 108  }
  0x11   : > { %s1288_s6 = smov (!%p131_p9), 107   ;;  %s1289_s7 = smov (!%p131_p9), 106  }
  0x12   : > { %s1290_s8 = smov (!%p131_p9), 88   ;;  %s1291_s9 = smov (!%p131_p9), 87  }
  0x13   : > { %v1366_v0 = vld [vmem:[%s155_s29 + $0x8] sm:$0x3]  ;;  %v1368_v1 = vld [vmem:[%s155_s29] sm:$0xff]  ;;  %s1292_s10 = smov 86   ;;  %vm186_vm0 = vcmask 1039360   ;;  %vm195_vm1 = vcmask 1041408  }
  0x14   : > { %165 = vst [vmem:[#allocation1 + $0x20] ss:$4 sm:$0xff] %v1366_v0  ;;  %v1121_v52 = vld [vmem:[%s1561_s1 + $0x4] sm:$0xf]  ;;  %vm191_vm2 = vcmask 31744   ;;  %vm353_vm3 = vcmask 1031168  }
  0x15   : > { %162 = vst [vmem:[#allocation1] ss:$4 sm:$0xff] %v1368_v1  ;;  %vm454_vm4 = vcmask 883712   ;;  %vm555_vm5 = vcmask 875520   ;;  %vm656_vm6 = vcmask 867328   ;;  %vm757_vm7 = vcmask 719872  }
  0x16   : > { %vm858_vm8 = vcmask 711680   ;;  %vm959_vm9 = vcmask 703488   ;;  %s146_s19 = sand.u32 1, %s1275_s13   ;;  %s1170_s25 = sshll.u32 %s1335_s16, 5 }
  0x17   : > { %s1118_s20 = sshll.u32 %s146_s19, 5  ;;  %s1061_s28 = scalar_lea.hbm %s1563_s3, %s1170_s25 }
  0x18   : > { %s1520_s24 = scalar_lea.vmem [#allocation2], %s1118_s20  ;;  %s1065_s29 = sshll.u32 %s1061_s28, 4  ;;  %s1066_s29 = int_to_ptr.hbm [resolvable:$true] %s1065_s29 }
  0x19   : > { %s1063_s16 = sshll.u32 %s1520_s24, 4  ;;  %s1064_s16 = int_to_ptr.vmem [resolvable:$true] %s1063_s16 }
  0x1b   : > { %v174_v2 = vld.sshfl [vmem:[#allocation1 + $0x20] sm:$0xff pattern:$0x73625140] }
  0x1c   : > { %184 = vrot.lane.b32.xlu1 %v174_v2, %s1285_s30  ;;  %332 = vst [vmem:[#allocation1 + $0x20] ss:$4 sm:$0xff] %v1366_v0  ;;  %v170_v3 = vld.sshfl [vmem:[#allocation1 + $0x10] sm:$0xff pattern:$0x73625140] }
  0x1d   : > { %180 = vrot.lane.b32.xlu0 %v170_v3, %s1285_s30  ;;  %v172_v4 = vld.sshfl [vmem:[#allocation1 + $0x18] sm:$0xff pattern:$0x73625140]  ;;  %v166_v5 = vld.sshfl [vmem:[#allocation1] sm:$0xff pattern:$0x73625140] }
  0x1e   : > { %v168_v6 = vld.sshfl [vmem:[#allocation1 + $0x8] sm:$0xff pattern:$0x73625140] }
  0x1f   : > { %260 = vst [vmem:[#allocation1] ss:$4 sm:$0xff] %v1368_v1  ;;  %178 = vrot.lane.b32.xlu2 %v168_v6, %s1285_s30 }
  0x23   : > { %v341_v7 = vld.sshfl [vmem:[#allocation1 + $0x20] sm:$0xff pattern:$0x73625140] }
  0x24   : > { %176 = vrot.lane.b32.xlu1 %v166_v5, %s1285_s30  ;;  %433 = vst [vmem:[#allocation1 + $0x20] ss:$4 sm:$0xff] %v1366_v0  ;;  %v158_v5 = vld [vmem:[%s1561_s1] sm:$0xf] }
  0x25   : > { %182 = vrot.lane.b32.xlu0 %v172_v4, %s1285_s30  ;;  %s1050_s30 = scalar_lea.sflag [#allocation3], %s146_s19 }
  0x26   : > { %v1375_v8 = vld.sshfl [vmem:[#allocation1] sm:$0xff pattern:$0x73625140]  ;;  %v1377_v9 = vld.sshfl [vmem:[#allocation1 + $0x8] sm:$0xff pattern:$0x73625140] }
  0x27   : > { %v1379_v10 = vld.sshfl [vmem:[#allocation1 + $0x10] sm:$0xff pattern:$0x73625140]  ;;  %v1381_v11 = vld.sshfl [vmem:[#allocation1 + $0x18] sm:$0xff pattern:$0x73625140] }
  0x28   : > { %330 = vst [vmem:[#allocation1] ss:$4 sm:$0xff] %v1368_v1  ;;  %v270_v50 = vsel %vm195_vm1, %v1377_v9, 0  ;;  %v272_v58 = vsel %vm195_vm1, %v1379_v10, 0  ;;  %v274_v62 = vsel %vm195_vm1, %v1381_v11, 0 }
  0x2b   : > { %v442_v12 = vld.sshfl [vmem:[#allocation1 + $0x20] sm:$0xff pattern:$0x73625140] }
  0x2c   : > { %351 = vrot.lane.b32.xlu1 %v341_v7, %s1286_s4  ;;  %534 = vst [vmem:[#allocation1 + $0x20] ss:$4 sm:$0xff] %v1366_v0 }
  0x2f   : > { %v339_v13 = vld.sshfl [vmem:[#allocation1 + $0x18] sm:$0xff pattern:$0x73625140]  ;;  %v333_v14 = vld.sshfl [vmem:[#allocation1] sm:$0xff pattern:$0x73625140] }
  0x30   : > { %349 = vrot.lane.b32.xlu0 %v339_v13, %s1286_s4  ;;  %v337_v15 = vld.sshfl [vmem:[#allocation1 + $0x10] sm:$0xff pattern:$0x73625140]  ;;  %v335_v16 = vld.sshfl [vmem:[#allocation1 + $0x8] sm:$0xff pattern:$0x73625140] }
  0x31   : > { %431 = vst [vmem:[#allocation1] ss:$4 sm:$0xff] %v1368_v1  ;;  %347 = vrot.lane.b32.xlu2 %v337_v15, %s1286_s4 }
  0x33   : > { %v543_v17 = vld.sshfl [vmem:[#allocation1 + $0x20] sm:$0xff pattern:$0x73625140] }
  0x34   : > { %635 = vst [vmem:[#allocation1 + $0x20] ss:$4 sm:$0xff] %v1366_v0 }
  0x38   : > { %345 = vrot.lane.b32.xlu0 %v335_v16, %s1286_s4  ;;  %v438_v18 = vld.sshfl [vmem:[#allocation1 + $0x10] sm:$0xff pattern:$0x73625140]  ;;  %v440_v19 = vld.sshfl [vmem:[#allocation1 + $0x18] sm:$0xff pattern:$0x73625140] }
  0x39   : > { %448 = vrot.lane.b32.xlu1 %v438_v18, %s1287_s5  ;;  %v436_v20 = vld.sshfl [vmem:[#allocation1 + $0x8] sm:$0xff pattern:$0x73625140]  ;;  %v434_v21 = vld.sshfl [vmem:[#allocation1] sm:$0xff pattern:$0x73625140]  ;;  %343 = vrot.lane.b32.xlu2 %v333_v14, %s1286_s4 }
  0x3a   : > { %532 = vst [vmem:[#allocation1] ss:$4 sm:$0xff] %v1368_v1  ;;  %s1235_s4 = sshra.s32 %s1066_s29, 4  ;;  %s1236_s4 = int_to_ptr.hbm [resolvable:$true] %s1235_s4 }
  0x3b   : > { %v644_v22 = vld.sshfl [vmem:[#allocation1 + $0x20] sm:$0xff pattern:$0x73625140]  ;;  %p1242_p13 = scmp.lt.s32.totalorder %s1236_s4, %s1563_s3 }
  0x3c   : > { %736 = vst [vmem:[#allocation1 + $0x20] ss:$4 sm:$0xff] %v1366_v0 }
  0x40   : > { %452 = vrot.lane.b32.xlu0 %v442_v12, %s1287_s5 }
  0x41   : > { %444 = vrot.lane.b32.xlu1 %v434_v21, %s1287_s5  ;;  %v541_v23 = vld.sshfl [vmem:[#allocation1 + $0x18] sm:$0xff pattern:$0x73625140]  ;;  %v539_v24 = vld.sshfl [vmem:[#allocation1 + $0x10] sm:$0xff pattern:$0x73625140]  ;;  %450 = vrot.lane.b32.xlu2 %v440_v19, %s1287_s5 }
  0x42   : > { %v537_v25 = vld.sshfl [vmem:[#allocation1 + $0x8] sm:$0xff pattern:$0x73625140]  ;;  %v535_v26 = vld.sshfl [vmem:[#allocation1] sm:$0xff pattern:$0x73625140] }
  0x43   : > { %633 = vst [vmem:[#allocation1] ss:$4 sm:$0xff] %v1368_v1  ;;  %v745_v27 = vld.sshfl [vmem:[#allocation1 + $0x20] sm:$0xff pattern:$0x73625140] }
  0x44   : > { %837 = vst [vmem:[#allocation1 + $0x20] ss:$4 sm:$0xff] %v1366_v0 }
  0x48   : > { %549 = vrot.lane.b32.xlu0 %v539_v24, %s1288_s6 }
  0x49   : > { %551 = vrot.lane.b32.xlu1 %v541_v23, %s1288_s6  ;;  %446 = vrot.lane.b32.xlu2 %v436_v20, %s1287_s5  ;;  %s1237_s5 = scalar_lea.hbm %s1236_s4, 32 }
  0x4a   : > { %v636_v28 = vld.sshfl [vmem:[#allocation1] sm:$0xff pattern:$0x73625140]  ;;  %v640_v29 = vld.sshfl [vmem:[#allocation1 + $0x10] sm:$0xff pattern:$0x73625140]  ;;  %p1238_p10 = scmp.ne.s32.totalorder %s1236_s4, %s1237_s5 }
  0x4b   : > { %v642_v30 = vld.sshfl [vmem:[#allocation1 + $0x18] sm:$0xff pattern:$0x73625140]  ;;  %v638_v31 = vld.sshfl [vmem:[#allocation1 + $0x8] sm:$0xff pattern:$0x73625140] }
  0x4c   : > { %734 = vst [vmem:[#allocation1] ss:$4 sm:$0xff] %v1368_v1  ;;  %v846_v32 = vld.sshfl [vmem:[#allocation1 + $0x20] sm:$0xff pattern:$0x73625140]  ;;  %p1239_p11 = pnand %p1238_p10, %p1352_p5 }
  0x4d   : > { %938 = vst [vmem:[#allocation1 + $0x20] ss:$4 sm:$0xff] %v1366_v0 }
  0x4e   : > { %p1240_p12 = pneg %p1239_p11 }
  0x50   : > { %545 = vrot.lane.b32.xlu0 %v535_v26, %s1288_s6 }
  0x51   : > { %547 = vrot.lane.b32.xlu1 %v537_v25, %s1288_s6  ;;  %553 = vrot.lane.b32.xlu2 %v543_v17, %s1288_s6 }
  0x53   : > { %v739_v33 = vld.sshfl [vmem:[#allocation1 + $0x8] sm:$0xff pattern:$0x73625140]  ;;  %v743_v34 = vld.sshfl [vmem:[#allocation1 + $0x18] sm:$0xff pattern:$0x73625140] }
  0x54   : > { %v741_v35 = vld.sshfl [vmem:[#allocation1 + $0x10] sm:$0xff pattern:$0x73625140]  ;;  %v737_v36 = vld.sshfl [vmem:[#allocation1] sm:$0xff pattern:$0x73625140] }
  0x55   : > { %835 = vst [vmem:[#allocation1] ss:$4 sm:$0xff] %v1368_v1  ;;  %v947_v42 = vld.sshfl [vmem:[#allocation1 + $0x20] sm:$0xff pattern:$0x73625140] }
  0x58   : > { %652 = vrot.lane.b32.xlu0 %v642_v30, %s1289_s7 }
  0x59   : > { %654 = vrot.lane.b32.xlu1 %v644_v22, %s1289_s7  ;;  %650 = vrot.lane.b32.xlu2 %v640_v29, %s1289_s7  ;;  %v1130_v22 = vld [vmem:[%s1561_s1 + $0x8] sm:$0xf] }
  0x5c   : > { %v844_v37 = vld.sshfl [vmem:[#allocation1 + $0x18] sm:$0xff pattern:$0x73625140]  ;;  %v842_v38 = vld.sshfl [vmem:[#allocation1 + $0x10] sm:$0xff pattern:$0x73625140] }
  0x5d   : > { %v840_v39 = vld.sshfl [vmem:[#allocation1 + $0x8] sm:$0xff pattern:$0x73625140]  ;;  %v838_v40 = vld.sshfl [vmem:[#allocation1] sm:$0xff pattern:$0x73625140] }
  0x5e   : > { %936 = vst [vmem:[#allocation1] ss:$4 sm:$0xff] %v1368_v1  ;;  %v268_v1 = vsel %vm195_vm1, %v1375_v8, 0 }
  0x60   : > { %648 = vrot.lane.b32.xlu0 %v638_v31, %s1289_s7 }
  0x61   : > { %751 = vrot.lane.b32.xlu1 %v741_v35, %s1290_s8  ;;  %646 = vrot.lane.b32.xlu2 %v636_v28, %s1289_s7 }
  0x65   : > { %v945_v41 = vld.sshfl [vmem:[#allocation1 + $0x18] sm:$0xff pattern:$0x73625140]  ;;  %v941_v44 = vld.sshfl [vmem:[#allocation1 + $0x8] sm:$0xff pattern:$0x73625140] }
  0x66   : > { %v943_v47 = vld.sshfl [vmem:[#allocation1 + $0x10] sm:$0xff pattern:$0x73625140]  ;;  %v939_v54 = vld.sshfl [vmem:[#allocation1] sm:$0xff pattern:$0x73625140] }
  0x68   : > { %755 = vrot.lane.b32.xlu0 %v745_v27, %s1290_s8 }
  0x69   : > { %747 = vrot.lane.b32.xlu1 %v737_v36, %s1290_s8  ;;  %753 = vrot.lane.b32.xlu2 %v743_v34, %s1290_s8 }
  0x70   : > { %852 = vrot.lane.b32.xlu0 %v842_v38, %s1291_s9 }
  0x71   : > { %854 = vrot.lane.b32.xlu1 %v844_v37, %s1291_s9  ;;  %749 = vrot.lane.b32.xlu2 %v739_v33, %s1290_s8  ;;  %v1135_v37 = vld [vmem:[%s1561_s1 + $0xc] sm:$0xf]  ;;  %s1241_s8 = scalar_lea.hbm %s1563_s3, 64 }
  0x72   : > { %p1243_p0 = scmp.lt.s32.totalorder %s1241_s8, %s1237_s5 }
  0x74   : > { %p1244_p1 = por %p1243_p0, %p1242_p13 }
  0x76   : > { %p1245_p2 = pnand %p1244_p1, %p1240_p12 }
  0x78   : > { %848 = vrot.lane.b32.xlu0 %v838_v40, %s1291_s9 }
  0x79   : > { %850 = vrot.lane.b32.xlu1 %v840_v39, %s1291_s9  ;;  %856 = vrot.lane.b32.xlu2 %v846_v32, %s1291_s9  ;;  %v179_v43 = vpop.permute.xlu2 %178 }
  0x80   : > { %955 = vrot.lane.b32.xlu0 %v945_v41, %s1292_s10 }
  0x81   : > { %957 = vrot.lane.b32.xlu1 %v947_v42, %s1292_s10  ;;  %953 = vrot.lane.b32.xlu2 %v943_v47, %s1292_s10 }
  0x88   : > { %951 = vrot.lane.b32.xlu0 %v941_v44, %s1292_s10 }
  0x89   : > { %949 = vrot.lane.b32.xlu2 %v939_v54, %s1292_s10 }
  0x8b   : > { %v348_v45 = vpop.permute.xlu2 %347 }
  0x8e   : > { %v185_v46 = vpop.permute.xlu1 %184 }
  0x8f   : > { %v181_v48 = vpop.permute.xlu0 %180 }
  0x90   : > { %v188_v49 = vsel %vm186_vm0, %v179_v43, %v181_v48 }
  0x91   : > { %v200_v51 = vsel %vm195_vm1, %v188_v49, 0 }
  0x92   : > { %228 = vmatpush.bf16.msra.mxu1 %v200_v51 }
  0x93   : > { %v344_v53 = vpop.permute.xlu2 %343 }
  0x95   : > { %1123 = vmatmul.msk.bf16.vlgmr.msra.gmra.mxu1 %vm191_vm2, %v1121_v52 }
  0x96   : > { %296 = vmatpush.bf16.msrb.mxu1 %v270_v50  ;;  %v177_v55 = vpop.permute.xlu1 %176 }
  0x97   : > { %v183_v56 = vpop.permute.xlu0 %182  ;;  %v187_v57 = vsel %vm186_vm0, %v177_v55, %v179_v43 }
  0x98   : > { %v197_v59 = vsel %vm195_vm1, %v187_v57, 0  ;;  %v189_v60 = vsel %vm186_vm0, %v181_v48, %v183_v56  ;;  %v190_v61 = vsel %vm186_vm0, %v183_v56, %v185_v46 }
  0x99   : > { %215 = vmatpush.bf16.msra.mxu0 %v197_v59  ;;  %v203_v63 = vsel %vm195_vm1, %v189_v60, 0  ;;  %v206_v0 = vsel %vm195_vm1, %v190_v61, 0 }
  0x9a   : > { %241 = vmatpush.bf16.msra.mxu2 %v203_v63  ;;  %254 = vmatpush.bf16.msra.mxu3 %v206_v0 }
  0x9b   : > { %v451_v2 = vpop.permute.xlu2 %450 }
  0x9c   : > { %1122 = vmatmul.msk.bf16.vlgmr.msra.gmra.mxu0 %vm191_vm2, %v1121_v52 }
  0x9d   : > { %1124 = vmatmul.msk.bf16.vlgmr.msra.gmra.mxu2 %vm191_vm2, %v1121_v52  ;;  %1125 = vmatmul.msk.bf16.vlgmr.msra.gmra.mxu3 %vm191_vm2, %v1121_v52  ;;  %v1140_v52 = vld [vmem:[%s1561_s1 + $0x10] sm:$0xf] }
  0x9e   : > { %309 = vmatpush.bf16.msrb.mxu2 %v272_v58  ;;  %322 = vmatpush.bf16.msrb.mxu3 %v274_v62  ;;  %v352_v3 = vpop.permute.xlu1 %351 }
  0x9f   : > { %283 = vmatpush.bf16.msrb.mxu0 %v268_v1 }
  0xa2   : > { %v350_v4 = vpop.permute.xlu0 %349 }
  0xa3   : > { %v356_v6 = vsel %vm353_vm3, %v348_v45, %v350_v4  ;;  %v357_v7 = vsel %vm353_vm3, %v350_v4, %v352_v3  ;;  %v447_v9 = vpop.permute.xlu2 %446 }
  0xa4   : > { %v368_v8 = vsel %vm195_vm1, %v356_v6, 0  ;;  %v371_v10 = vsel %vm195_vm1, %v357_v7, 0 }
  0xa5   : > { %1127 = vmatmul.msk.bf16.vlgmr.msrb.gmra.mxu1 %vm191_vm2, %v158_v5  ;;  %406 = vmatpush.bf16.msra.mxu2 %v368_v8 }
  0xa6   : > { %419 = vmatpush.bf16.msra.mxu3 %v371_v10 }
  0xaa   : > { %v346_v11 = vpop.permute.xlu0 %345 }
  0xab   : > { %v355_v12 = vsel %vm353_vm3, %v346_v11, %v348_v45  ;;  %v354_v13 = vsel %vm353_vm3, %v344_v53, %v346_v11  ;;  %v449_v14 = vpop.permute.xlu1 %448  ;;  %v554_v15 = vpop.permute.xlu2 %553 }
  0xac   : > { %v365_v16 = vsel %vm195_vm1, %v355_v12, 0  ;;  %v362_v17 = vsel %vm195_vm1, %v354_v13, 0  ;;  %1126 = vmatmul.msk.bf16.vlgmr.msrb.gmra.mxu0 %vm191_vm2, %v158_v5  ;;  %v457_v18 = vsel %vm454_vm4, %v449_v14, %v451_v2  ;;  %v456_v19 = vsel %vm454_vm4, %v447_v9, %v449_v14 }
  0xad   : > { %393 = vmatpush.bf16.msra.mxu1 %v365_v16  ;;  %1128 = vmatmul.msk.bf16.vlgmr.msrb.gmra.mxu2 %vm191_vm2, %v158_v5  ;;  %v469_v20 = vsel %vm195_vm1, %v457_v18, 0  ;;  %v466_v21 = vsel %vm195_vm1, %v456_v19, 0 }
  0xae   : > { %1129 = vmatmul.msk.bf16.vlgmr.msrb.gmra.mxu3 %vm191_vm2, %v158_v5  ;;  %380 = vmatpush.bf16.msra.mxu0 %v362_v17  ;;  %v1145_v5 = vld [vmem:[%s1561_s1 + $0x14] sm:$0xf] }
  0xaf   : > { %507 = vmatpush.bf16.msrb.mxu2 %v469_v20  ;;  %v1150_v20 = vld [vmem:[%s1561_s1 + $0x18] sm:$0xf] }
  0xb1   : > { %494 = vmatpush.bf16.msrb.mxu1 %v466_v21 }
  0xb2   : > { %v453_v23 = vpop.permute.xlu0 %452 }
  0xb3   : > { %v458_v24 = vsel %vm454_vm4, %v451_v2, %v453_v23  ;;  %v445_v25 = vpop.permute.xlu1 %444  ;;  %v651_v26 = vpop.permute.xlu2 %650 }
  0xb4   : > { %v472_v27 = vsel %vm195_vm1, %v458_v24, 0  ;;  %v455_v28 = vsel %vm454_vm4, %v445_v25, %v447_v9 }
  0xb5   : > { %1132 = vmatmul.msk.bf16.vlgmr.msra.gmra.mxu1 %vm191_vm2, %v1130_v22  ;;  %v463_v29 = vsel %vm195_vm1, %v455_v28, 0  ;;  %520 = vmatpush.bf16.msrb.mxu3 %v472_v27 }
  0xb6   : > { %481 = vmatpush.bf16.msrb.mxu0 %v463_v29 }
  0xba   : > { %v550_v30 = vpop.permute.xlu0 %549 }
  0xbb   : > { %v552_v31 = vpop.permute.xlu1 %551  ;;  %v647_v36 = vpop.permute.xlu2 %646 }
  0xbc   : > { %1131 = vmatmul.msk.bf16.vlgmr.msra.gmra.mxu0 %vm191_vm2, %v1130_v22  ;;  %v558_v32 = vsel %vm555_vm5, %v550_v30, %v552_v31  ;;  %v559_v33 = vsel %vm555_vm5, %v552_v31, %v554_v15 }
  0xbd   : > { %1133 = vmatmul.msk.bf16.vlgmr.msra.gmra.mxu2 %vm191_vm2, %v1130_v22  ;;  %v570_v34 = vsel %vm195_vm1, %v558_v32, 0  ;;  %v573_v35 = vsel %vm195_vm1, %v559_v33, 0  ;;  %v1293_v33 = vmov 0  }
  0xbe   : > { %1134 = vmatmul.msk.bf16.vlgmr.msra.gmra.mxu3 %vm191_vm2, %v1130_v22  ;;  %608 = vmatpush.bf16.msra.mxu2 %v570_v34  ;;  %v1155_v34 = vld [vmem:[%s1561_s1 + $0x1c] sm:$0xf] }
  0xbf   : > { %621 = vmatpush.bf16.msra.mxu3 %v573_v35  ;;  %1219 = vset.pattern.permute.xlu1 %v1293_v33  ;;  %v1035_v35 = vld [vmem:[%s1562_s2] sm:$0xff] }
  0xc0   : > { %1220 = vset.pattern.permute.xlu0 %v1293_v33  ;;  %1038 = vperm.xlu1 %1219, %v1035_v35  }
  0xc2   : > { %v546_v38 = vpop.permute.xlu0 %545 }
  0xc3   : > { %v548_v39 = vpop.permute.xlu1 %547  ;;  %v754_v44 = vpop.permute.xlu2 %753 }
  0xc4   : > { %v557_v40 = vsel %vm555_vm5, %v548_v39, %v550_v30  ;;  %v556_v41 = vsel %vm555_vm5, %v546_v38, %v548_v39 }
  0xc5   : > { %1137 = vmatmul.msk.bf16.vlgmr.msrb.gmra.mxu1 %vm191_vm2, %v1135_v37  ;;  %v567_v42 = vsel %vm195_vm1, %v557_v40, 0  ;;  %v564_v43 = vsel %vm195_vm1, %v556_v41, 0 }
  0xc6   : > { %595 = vmatpush.bf16.msra.mxu1 %v567_v42  ;;  %582 = vmatpush.bf16.msra.mxu0 %v564_v43 }
  0xca   : > { %v653_v45 = vpop.permute.xlu0 %652 }
  0xcb   : > { %v659_v46 = vsel %vm656_vm6, %v651_v26, %v653_v45  ;;  %v655_v47 = vpop.permute.xlu1 %654  ;;  %v750_v51 = vpop.permute.xlu2 %749 }
  0xcc   : > { %1136 = vmatmul.msk.bf16.vlgmr.msrb.gmra.mxu0 %vm191_vm2, %v1135_v37  ;;  %v671_v48 = vsel %vm195_vm1, %v659_v46, 0  ;;  %v660_v49 = vsel %vm656_vm6, %v653_v45, %v655_v47 }
  0xcd   : > { %1138 = vmatmul.msk.bf16.vlgmr.msrb.gmra.mxu2 %vm191_vm2, %v1135_v37  ;;  %v674_v50 = vsel %vm195_vm1, %v660_v49, 0 }
  0xce   : > { %1139 = vmatmul.msk.bf16.vlgmr.msrb.gmra.mxu3 %vm191_vm2, %v1135_v37  ;;  %709 = vmatpush.bf16.msrb.mxu2 %v671_v48  ;;  %v1160_v37 = vld [vmem:[%s1561_s1 + $0x20] sm:$0xf] }
  0xcf   : > { %722 = vmatpush.bf16.msrb.mxu3 %v674_v50 }
  0xd2   : > { %v649_v53 = vpop.permute.xlu0 %648 }
  0xd3   : > { %v658_v54 = vsel %vm656_vm6, %v649_v53, %v651_v26  ;;  %v657_v55 = vsel %vm656_vm6, %v647_v36, %v649_v53  ;;  %v752_v56 = vpop.permute.xlu1 %751  ;;  %v857_v9 = vpop.permute.xlu2 %856 }
  0xd4   : > { %v668_v57 = vsel %vm195_vm1, %v658_v54, 0  ;;  %v665_v58 = vsel %vm195_vm1, %v657_v55, 0  ;;  %v759_v59 = vsel %vm757_vm7, %v750_v51, %v752_v56  ;;  %v760_v61 = vsel %vm757_vm7, %v752_v56, %v754_v44 }
  0xd5   : > { %1142 = vmatmul.msk.bf16.vlgmr.msra.gmra.mxu1 %vm191_vm2, %v1140_v52  ;;  %683 = vmatpush.bf16.msrb.mxu0 %v665_v58  ;;  %v769_v60 = vsel %vm195_vm1, %v759_v59, 0  ;;  %v772_v63 = vsel %vm195_vm1, %v760_v61, 0 }
  0xd6   : > { %696 = vmatpush.bf16.msrb.mxu1 %v668_v57 }
  0xda   : > { %797 = vmatpush.bf16.msra.mxu1 %v769_v60  ;;  %v756_v62 = vpop.permute.xlu0 %755 }
  0xdb   : > { %v761_v0 = vsel %vm757_vm7, %v754_v44, %v756_v62  ;;  %v748_v1 = vpop.permute.xlu1 %747  ;;  %v954_v19 = vpop.permute.xlu2 %953 }
  0xdc   : > { %1141 = vmatmul.msk.bf16.vlgmr.msra.gmra.mxu0 %vm191_vm2, %v1140_v52  ;;  %v775_v2 = vsel %vm195_vm1, %v761_v0, 0  ;;  %v758_v3 = vsel %vm757_vm7, %v748_v1, %v750_v51 }
  0xdd   : > { %1143 = vmatmul.msk.bf16.vlgmr.msra.gmra.mxu2 %vm191_vm2, %v1140_v52  ;;  %v766_v4 = vsel %vm195_vm1, %v758_v3, 0 }
  0xde   : > { %1144 = vmatmul.msk.bf16.vlgmr.msra.gmra.mxu3 %vm191_vm2, %v1140_v52  ;;  %810 = vmatpush.bf16.msra.mxu2 %v772_v63 }
  0xdf   : > { %823 = vmatpush.bf16.msra.mxu3 %v775_v2  ;;  %784 = vmatpush.bf16.msra.mxu0 %v766_v4 }
  0xe2   : > { %v853_v6 = vpop.permute.xlu0 %852 }
  0xe3   : > { %v855_v7 = vpop.permute.xlu1 %854  ;;  %v950_v24 = vpop.permute.xlu2 %949 }
  0xe4   : > { %v861_v8 = vsel %vm858_vm8, %v853_v6, %v855_v7  ;;  %v862_v10 = vsel %vm858_vm8, %v855_v7, %v857_v9 }
  0xe5   : > { %1147 = vmatmul.msk.bf16.vlgmr.msrb.gmra.mxu1 %vm191_vm2, %v1145_v5  ;;  %v873_v13 = vsel %vm195_vm1, %v861_v8, 0  ;;  %v876_v14 = vsel %vm195_vm1, %v862_v10, 0 }
  0xea   : > { %v849_v11 = vpop.permute.xlu0 %848 }
  0xeb   : > { %v851_v12 = vpop.permute.xlu1 %850 }
  0xec   : > { %1146 = vmatmul.msk.bf16.vlgmr.msrb.gmra.mxu0 %vm191_vm2, %v1145_v5  ;;  %v860_v15 = vsel %vm858_vm8, %v851_v12, %v853_v6  ;;  %v859_v16 = vsel %vm858_vm8, %v849_v11, %v851_v12 }
  0xed   : > { %1148 = vmatmul.msk.bf16.vlgmr.msrb.gmra.mxu2 %vm191_vm2, %v1145_v5  ;;  %v870_v17 = vsel %vm195_vm1, %v860_v15, 0  ;;  %v867_v18 = vsel %vm195_vm1, %v859_v16, 0 }
  0xee   : > { %1149 = vmatmul.msk.bf16.vlgmr.msrb.gmra.mxu3 %vm191_vm2, %v1145_v5  ;;  %898 = vmatpush.bf16.msrb.mxu1 %v870_v17 }
  0xef   : > { %911 = vmatpush.bf16.msrb.mxu2 %v873_v13  ;;  %924 = vmatpush.bf16.msrb.mxu3 %v876_v14 }
  0xf0   : > { %885 = vmatpush.bf16.msrb.mxu0 %v867_v18 }
  0xf2   : > { %v956_v21 = vpop.permute.xlu0 %955 }
  0xf3   : > { %v958_v22 = vpop.permute.xlu1 %957  ;;  %v962_v23 = vsel %vm959_vm9, %v954_v19, %v956_v21 }
  0xf4   : > { %v963_v25 = vsel %vm959_vm9, %v956_v21, %v958_v22  ;;  %v974_v27 = vsel %vm195_vm1, %v962_v23, 0 }
  0xf5   : > { %1152 = vmatmul.msk.bf16.vlgmr.msra.gmra.mxu1 %vm191_vm2, %v1150_v20  ;;  %v977_v30 = vsel %vm195_vm1, %v963_v25, 0 }
  0xfa   : > { %v952_v26 = vpop.permute.xlu0 %951 }
  0xfb   : > { %v961_v28 = vsel %vm959_vm9, %v952_v26, %v954_v19  ;;  %v960_v29 = vsel %vm959_vm9, %v950_v24, %v952_v26 }
  0xfc   : > { %1151 = vmatmul.msk.bf16.vlgmr.msra.gmra.mxu0 %vm191_vm2, %v1150_v20  ;;  %v971_v31 = vsel %vm195_vm1, %v961_v28, 0  ;;  %v968_v32 = vsel %vm195_vm1, %v960_v29, 0 }
  0xfd   : > { %1153 = vmatmul.msk.bf16.vlgmr.msra.gmra.mxu2 %vm191_vm2, %v1150_v20  ;;  %999 = vmatpush.bf16.msra.mxu1 %v971_v31 }
  0xfe   : > { %1154 = vmatmul.msk.bf16.vlgmr.msra.gmra.mxu3 %vm191_vm2, %v1150_v20  ;;  %1012 = vmatpush.bf16.msra.mxu2 %v974_v27 }
  0xff   : > { %1025 = vmatpush.bf16.msra.mxu3 %v977_v30  ;;  %986 = vmatpush.bf16.msra.mxu0 %v968_v32 }
 0x105   : > { %1157 = vmatmul.msk.bf16.vlgmr.msrb.gmra.mxu1 %vm191_vm2, %v1155_v34 }
 0x10c   : > { %1156 = vmatmul.msk.bf16.vlgmr.msrb.gmra.mxu0 %vm191_vm2, %v1155_v34 }
 0x10d   : > { %1158 = vmatmul.msk.bf16.vlgmr.msrb.gmra.mxu2 %vm191_vm2, %v1155_v34 }
 0x10e   : > { %1159 = vmatmul.msk.bf16.vlgmr.msrb.gmra.mxu3 %vm191_vm2, %v1155_v34 }
 0x112   : > { %v230_v36 = vpop.f32.mrf.mxu1 }
 0x115   : > { %1162 = vmatmul.msk.bf16.vlgmr.msra.gmra.mxu1 %vm191_vm2, %v1160_v37 }
 0x119   : > { %v217_v38 = vpop.f32.mrf.mxu0 }
 0x11a   : > { %v232_v39 = vpop.f32.mrf.mxu1 }
 0x11c   : > { %1161 = vmatmul.msk.bf16.vlgmr.msra.gmra.mxu0 %vm191_vm2, %v1160_v37 }
 0x11d   : > { %1163 = vmatmul.msk.bf16.vlgmr.msra.gmra.mxu2 %vm191_vm2, %v1160_v37 }
 0x11e   : > { %1164 = vmatmul.msk.bf16.vlgmr.msra.gmra.mxu3 %vm191_vm2, %v1160_v37 }
 0x120   : > { %v243_v40 = vpop.f32.mrf.mxu2  ;;  %v256_v41 = vpop.f32.mrf.mxu3 }
 0x121   : > { %v219_v42 = vpop.f32.mrf.mxu0 }
 0x122   : > { %v298_v43 = vpop.f32.mrf.mxu1 }
 0x123   : > { %v299_v44 = vadd.f32 %v298_v43, %v230_v36 }
 0x128   : > { %v245_v45 = vpop.f32.mrf.mxu2  ;;  %v258_v46 = vpop.f32.mrf.mxu3 }
 0x129   : > { %v285_v47 = vpop.f32.mrf.mxu0 }
 0x12a   : > { %v286_v48 = vadd.f32 %v285_v47, %v217_v38  ;;  %v300_v49 = vpop.f32.mrf.mxu1 }
 0x130   : > { %v311_v50 = vpop.f32.mrf.mxu2 }
 0x131   : > { %v312_v51 = vadd.f32 %v311_v50, %v243_v40  ;;  %v324_v52 = vpop.f32.mrf.mxu3  ;;  %v287_v53 = vpop.f32.mrf.mxu0 }
 0x132   : > { %v325_v54 = vadd.f32 %v324_v52, %v256_v41  ;;  %v395_v55 = vpop.f32.mrf.mxu1  ;;  %v1039_v53 = vpop.permute.xlu1 %1038 }
 0x133   : > { %v426_v56 = vadd.f32 %v395_v55, %v299_v44 }
 0x138   : > { %v313_v57 = vpop.f32.mrf.mxu2 }
 0x139   : > { %v326_v58 = vpop.f32.mrf.mxu3  ;;  %v382_v59 = vpop.f32.mrf.mxu0 }
 0x13a   : > { %v425_v60 = vadd.f32 %v382_v59, %v286_v48  ;;  %v397_v61 = vpop.f32.mrf.mxu1 }
 0x140   : > { %v408_v62 = vpop.f32.mrf.mxu2 }
 0x141   : > { %v427_v63 = vadd.f32 %v408_v62, %v312_v51  ;;  %v421_v0 = vpop.f32.mrf.mxu3  ;;  %v384_v1 = vpop.f32.mrf.mxu0 }
 0x142   : > { %v428_v2 = vadd.f32 %v421_v0, %v325_v54  ;;  %v496_v3 = vpop.f32.mrf.mxu1 }
 0x143   : > { %v527_v4 = vadd.f32 %v496_v3, %v426_v56 }
 0x148   : > { %v410_v5 = vpop.f32.mrf.mxu2 }
 0x149   : > { %v423_v6 = vpop.f32.mrf.mxu3  ;;  %v483_v7 = vpop.f32.mrf.mxu0 }
 0x14a   : > { %v526_v9 = vadd.f32 %v483_v7, %v425_v60  ;;  %v498_v8 = vpop.f32.mrf.mxu1 }
 0x150   : > { %v509_v10 = vpop.f32.mrf.mxu2 }
 0x151   : > { %v528_v11 = vadd.f32 %v509_v10, %v427_v63  ;;  %v522_v12 = vpop.f32.mrf.mxu3  ;;  %v485_v13 = vpop.f32.mrf.mxu0 }
 0x152   : > { %v529_v14 = vadd.f32 %v522_v12, %v428_v2  ;;  %v597_v15 = vpop.f32.mrf.mxu1 }
 0x153   : > { %v628_v44 = vadd.f32 %v597_v15, %v527_v4 }
 0x158   : > { %v511_v16 = vpop.f32.mrf.mxu2 }
 0x159   : > { %v524_v17 = vpop.f32.mrf.mxu3  ;;  %v584_v18 = vpop.f32.mrf.mxu0 }
 0x15a   : > { %v599_v19 = vpop.f32.mrf.mxu1  ;;  %v627_v51 = vadd.f32 %v584_v18, %v526_v9 }
 0x160   : > { %v610_v20 = vpop.f32.mrf.mxu2 }
 0x161   : > { %v623_v21 = vpop.f32.mrf.mxu3  ;;  %v586_v22 = vpop.f32.mrf.mxu0  ;;  %v629_v60 = vadd.f32 %v610_v20, %v528_v11 }
 0x162   : > { %v698_v23 = vpop.f32.mrf.mxu1  ;;  %v630_v63 = vadd.f32 %v623_v21, %v529_v14 }
 0x163   : > { %v729_v45 = vadd.f32 %v698_v23, %v628_v44 }
 0x168   : > { %v612_v24 = vpop.f32.mrf.mxu2 }
 0x169   : > { %v625_v25 = vpop.f32.mrf.mxu3  ;;  %v685_v26 = vpop.f32.mrf.mxu0 }
 0x16a   : > { %v700_v27 = vpop.f32.mrf.mxu1  ;;  %v728_v55 = vadd.f32 %v685_v26, %v627_v51 }
 0x170   : > { %v711_v28 = vpop.f32.mrf.mxu2 }
 0x171   : > { %v724_v29 = vpop.f32.mrf.mxu3  ;;  %v687_v30 = vpop.f32.mrf.mxu0  ;;  %v730_v2 = vadd.f32 %v711_v28, %v629_v60 }
 0x172   : > { %v799_v31 = vpop.f32.mrf.mxu1  ;;  %v731_v3 = vadd.f32 %v724_v29, %v630_v63 }
 0x173   : > { %v830_v46 = vadd.f32 %v799_v31, %v729_v45 }
 0x178   : > { %v713_v32 = vpop.f32.mrf.mxu2 }
 0x179   : > { %v726_v33 = vpop.f32.mrf.mxu3  ;;  %v786_v34 = vpop.f32.mrf.mxu0 }
 0x17a   : > { %v801_v35 = vpop.f32.mrf.mxu1  ;;  %v829_v57 = vadd.f32 %v786_v34, %v728_v55 }
 0x180   : > { %v812_v36 = vpop.f32.mrf.mxu2 }
 0x181   : > { %v825_v37 = vpop.f32.mrf.mxu3  ;;  %v788_v38 = vpop.f32.mrf.mxu0  ;;  %v831_v5 = vadd.f32 %v812_v36, %v730_v2 }
 0x182   : > { %v900_v39 = vpop.f32.mrf.mxu1  ;;  %v832_v6 = vadd.f32 %v825_v37, %v731_v3 }
 0x183   : > { %v931_v48 = vadd.f32 %v900_v39, %v830_v46 }
 0x188   : > { %v814_v40 = vpop.f32.mrf.mxu2 }
 0x189   : > { %v827_v41 = vpop.f32.mrf.mxu3  ;;  %v887_v42 = vpop.f32.mrf.mxu0 }
 0x18a   : > { %v902_v43 = vpop.f32.mrf.mxu1  ;;  %v930_v58 = vadd.f32 %v887_v42, %v829_v57 }
 0x190   : > { %v913_v47 = vpop.f32.mrf.mxu2 }
 0x191   : > { %v926_v49 = vpop.f32.mrf.mxu3  ;;  %v889_v50 = vpop.f32.mrf.mxu0  ;;  %v932_v7 = vadd.f32 %v913_v47, %v831_v5 }
 0x192   : > { %v1001_v52 = vpop.f32.mrf.mxu1  ;;  %v933_v9 = vadd.f32 %v926_v49, %v832_v6 }
 0x193   : > { %v1032_v54 = vadd.f32 %v1001_v52, %v931_v48 }
 0x195   : > { %v1042_v56 = vadd.f32 %v1039_v53, %v1032_v54 }
 0x197   : > { %1046 = vst [vmem:[%s1520_s24 + $0x8] sm:$0xff] %v1042_v56 }
 0x198   : > { %v915_v59 = vpop.f32.mrf.mxu2 }
 0x199   : > { %v928_v61 = vpop.f32.mrf.mxu3  ;;  %v988_v62 = vpop.f32.mrf.mxu0 }
 0x19a   : > { %v1031_v0 = vadd.f32 %v988_v62, %v930_v58  ;;  %v1003_v1 = vpop.f32.mrf.mxu1 }
 0x19c   : > { %v1041_v4 = vadd.f32 %v1039_v53, %v1031_v0 }
 0x19e   : > { %1045 = vst [vmem:[%s1520_s24] sm:$0xff] %v1041_v4 }
 0x1a0   : > { %v1014_v8 = vpop.f32.mrf.mxu2 }
 0x1a1   : > { %v1033_v10 = vadd.f32 %v1014_v8, %v932_v7  ;;  %v1027_v11 = vpop.f32.mrf.mxu3  ;;  %v990_v12 = vpop.f32.mrf.mxu0 }
 0x1a2   : > { %v1034_v13 = vadd.f32 %v1027_v11, %v933_v9 }
 0x1a3   : > { %v1043_v14 = vadd.f32 %v1039_v53, %v1033_v10 }
 0x1a4   : > { %v1044_v15 = vadd.f32 %v1039_v53, %v1034_v13 }
 0x1a5   : > { %1047 = vst [vmem:[%s1520_s24 + $0x10] sm:$0xff] %v1043_v14 }
 0x1a6   : > { %1048 = vst [vmem:[%s1520_s24 + $0x18] sm:$0xff] %v1044_v15 }
 0x1a7   : > { %1248 = shalt.err (!%p1245_p2)
}
 0x1a8   : > { %1171 = dma.vmem_to_hbm [thread:$0]  (%p1352_p5), %s1064_s16, 512, %s1066_s29, %s1050_s30   ;;  %v1016_v16 = vpop.f32.mrf.mxu2 }
 0x1a9   : > { %v1029_v17 = vpop.f32.mrf.mxu3 }
 0x1aa PF: > { %p1177_p3 = scmp.ge.s32.totalorder %s1283_s15, 2  ;;  %s1077_s11 = sand.u32 1, %s1271_s12  }
 0x1ab   : > { %s1078_s17 = scalar_lea.sflag [#allocation3], %s1077_s11 }
 0x1ac   : > { %p1174_p4 = pnand %p1177_p3, %p1356_p6 }
 0x1ae   : > { %p1175_p7 = pneg %p1174_p4 }
 0x1b0   : > { %1266 = dma.done.wait (%p1175_p7), %s1078_s17, 512  }
 0x1b1   : > { %1268 = vsyncadd (%p1175_p7), %s1078_s17, 4294966784  ;;  %p13_p5 = scmp.ge.s32.totalorder %s1339_s18, 4   ;;  %s1566_s12 = smov %s1275_s13 }
 0x1b2   : > { %s1567_s13 = smov %s1279_s14  ;;  %s1568_s14 = smov %s1350_s21 }
 0x1b3   : > { %s1569_s15 = smov %s1339_s18  ;;  %15 = sbr.rel (!%p13_p5) target bundleno = 3 (0x3), region = 81 }
 0x1b8   :  { %1084 = vsyncpa [#allocation3], 1 }
 0x1b9   :  { %1086 = vsyncpa [#allocation3 + $0x1], 1 }

</bundles_post_ra>
